<compile_context>
chip_gen: v7x
topology: tpu7x:2x2x1
jax: 0.10.0
libtpu: 0.0.40
codegen_flags: <defaults>
</compile_context>

<pallas_src>
import jax
import jax.numpy as jnp
from jax import lax
from jax.experimental import pallas as pl
from jax.experimental.pallas import tpu as pltpu


# ----------------------------- Pallas kernel ------------------------------ #
def _repvgg_tile_kernel(x_ref, w_ref, b_ref, o_ref):
    """One (batch element, row-tile) grid step.

    x_ref: (Hp, Wp, Cin)  bf16  full spatially padded image (Hp=H+2, Wp=W+2)
    w_ref: (9*Cin, Cout)  bf16  fused 3x3 kernel, tap-major along K
    b_ref: (1, Cout)      f32   fused bias
    o_ref: (TH, W, Cout)  f32   output row tile
    """
    TH, W, Cout = o_ref.shape
    Cin = x_ref.shape[-1]

    # Output rows [h*TH, h*TH+TH) need padded input rows [h*TH, h*TH+TH+2).
    row0 = pl.multiple_of(pl.program_id(1) * TH, TH)
    slab = x_ref[pl.ds(row0, TH + 2), :, :]            # (TH+2, Wp, Cin) bf16

    # im2col: concat the 9 taps on the lane (channel) axis, then one reshape
    # to the matmul M dimension.  Tap order (ki major, kj, then cin) matches
    # the (3,3,Cin,Cout) -> (9*Cin,Cout) weight flattening below.
    taps = [slab[ki:ki + TH, kj:kj + W, :]             # (TH, W, Cin) each
            for ki in range(3) for kj in range(3)]
    patch = jnp.concatenate(taps, axis=-1)             # (TH, W, 9*Cin)
    patch = patch.reshape(TH * W, 9 * Cin)             # (TH*W, 9*Cin) bf16

    acc = jnp.dot(patch, w_ref[...], preferred_element_type=jnp.float32)
    acc = acc + b_ref[...]                             # f32 epilogue
    out = jnp.maximum(acc, 0.0)                        # ReLU
    o_ref[...] = out.reshape(TH, W, Cout).astype(o_ref.dtype)


def repvgg_block_pallas(x_nchw, w_fused_ochw, b_fused, *, block_rows=None):
    """x_nchw: (N, Cin, H, W); w_fused_ochw: (Cout, Cin, 3, 3); b_fused: (Cout,)."""
    N, Cin, H, W = x_nchw.shape
    Cout = w_fused_ochw.shape[0]

    if block_rows is None:
        # Largest row tile whose im2col M dimension stays <= ~1024 rows
        # (amortizes per-grid-step overhead, keeps the MXU M dim healthy).
        block_rows = max(
            (d for d in range(1, H + 1) if H % d == 0 and d * W <= 1024), default=1)
    if H % block_rows != 0:
        raise ValueError(f"block_rows={block_rows} must divide H={H}")
    TH = block_rows
    Hp, Wp = H + 2, W + 2

    # NCHW -> NHWC (channels on the TPU lane axis), zero-pad H/W by 1, bf16.
    x_nhwc = jnp.transpose(x_nchw, (0, 2, 3, 1))
    x_pad = jnp.pad(x_nhwc, ((0, 0), (1, 1), (1, 1), (0, 0))).astype(jnp.bfloat16)

    # (O, I, 3, 3) -> (3, 3, I, O) -> (9*I, O): tap-major along K, matching the
    # kernel's patch column ordering.
    w_mat = (jnp.transpose(w_fused_ochw, (2, 3, 1, 0))
             .reshape(9 * Cin, Cout).astype(jnp.bfloat16))
    b2 = b_fused.reshape(1, Cout).astype(jnp.float32)

    # VMEM budget: double-buffered image + output tile, weights, plus the
    # in-kernel im2col patch / f32 accumulator (which may spill to VMEM).
    img_b = Hp * Wp * Cin * 2
    out_b = TH * W * Cout * 4
    w_b = 9 * Cin * Cout * 2 + Cout * 4
    tmp_b = TH * W * (9 * Cin * 2 + Cout * 4)
    vmem_limit = int(min(max(2 * (2 * img_b + 2 * out_b + w_b + tmp_b),
                             16 * 1024 * 1024), 48 * 1024 * 1024))

    cost = pl.CostEstimate(
        flops=2 * N * H * W * 9 * Cin * Cout,
        transcendentals=0,
        bytes_accessed=(N * Hp * Wp * Cin * 2 + 9 * Cin * Cout * 2
                        + N * H * W * Cout * 4),
    )

    out_nhwc = pl.pallas_call(
        _repvgg_tile_kernel,
        out_shape=jax.ShapeDtypeStruct((N, H, W, Cout), jnp.float32),
        grid_spec=pltpu.PrefetchScalarGridSpec(
            num_scalar_prefetch=0,
            grid=(N, H // TH),
            in_specs=[
                # Full padded image of batch element n; the block index does
                # not depend on the row-tile axis, so it is DMA'd once per
                # image and reused across all of its row tiles.
                pl.BlockSpec((None, Hp, Wp, Cin), lambda n, h: (n, 0, 0, 0)),
                pl.BlockSpec((9 * Cin, Cout), lambda n, h: (0, 0)),
                pl.BlockSpec((1, Cout), lambda n, h: (0, 0)),
            ],
            out_specs=pl.BlockSpec((None, TH, W, Cout), lambda n, h: (n, h, 0, 0)),
        ),
        compiler_params=pltpu.CompilerParams(
            dimension_semantics=("parallel", "arbitrary"),
            vmem_limit_bytes=vmem_limit,
        ),
        cost_estimate=cost,
    )(x_pad, w_mat, b2)

    # NHWC -> NCHW to match the PyTorch module's convention.
    return jnp.transpose(out_nhwc, (0, 3, 1, 2))


# ----------------------- parameter setup / BN fusion ----------------------- #
def _fuse_bn(kernel_ochw, gamma, beta, mean, var, eps=1e-5):
    std = jnp.sqrt(var + eps)
    t = (gamma / std).reshape(-1, 1, 1, 1)
    return kernel_ochw * t, beta - mean * gamma / std


def make_repvgg_params(key, in_channels, out_channels):
    """Deterministic params for rbr_dense (3x3 conv+BN), rbr_1x1 (1x1 conv+BN)
    and rbr_identity (BN), folded into one 3x3 kernel + bias exactly as
    get_equivalent_kernel_bias does (eval-mode BN)."""
    ks = jax.random.split(key, 12)
    Ci, Co = in_channels, out_channels

    k3 = jax.random.normal(ks[0], (Co, Ci, 3, 3), jnp.float32) * 0.1
    g3 = jax.random.uniform(ks[1], (Co,), jnp.float32, 0.5, 1.5)
    b3 = jax.random.normal(ks[2], (Co,), jnp.float32) * 0.1
    m3 = jax.random.normal(ks[3], (Co,), jnp.float32) * 0.1
    v3 = jax.random.uniform(ks[4], (Co,), jnp.float32, 0.5, 1.5)

    k1 = jax.random.normal(ks[5], (Co, Ci, 1, 1), jnp.float32) * 0.1
    g1 = jax.random.uniform(ks[6], (Co,), jnp.float32, 0.5, 1.5)
    b1 = jax.random.normal(ks[7], (Co,), jnp.float32) * 0.1
    m1 = jax.random.normal(ks[8], (Co,), jnp.float32) * 0.1
    v1 = jax.random.uniform(ks[9], (Co,), jnp.float32, 0.5, 1.5)

    fk3, fb3 = _fuse_bn(k3, g3, b3, m3, v3)
    fk1, fb1 = _fuse_bn(k1, g1, b1, m1, v1)
    fk1 = jnp.pad(fk1, ((0, 0), (0, 0), (1, 1), (1, 1)))   # 1x1 -> 3x3

    if Ci == Co:   # identity BN branch exists (stride == 1)
        gid = jax.random.uniform(ks[10], (Co,), jnp.float32, 0.5, 1.5)
        bid = jax.random.normal(ks[11], (Co,), jnp.float32) * 0.1
        mid = jnp.zeros((Co,), jnp.float32)
        vid = jnp.ones((Co,), jnp.float32)
        kid = jnp.zeros((Co, Ci, 3, 3), jnp.float32)
        kid = kid.at[jnp.arange(Co), jnp.arange(Ci), 1, 1].set(1.0)
        fkid, fbid = _fuse_bn(kid, gid, bid, mid, vid)
    else:
        fkid, fbid = 0.0, 0.0

    return fk3 + fk1 + fkid, fb3 + fb1 + fbid


# ------------------------------ reference --------------------------------- #
def repvgg_ref(x_nchw, w_ochw, b):
    """Plain-XLA reference with the same bf16-in / f32-accumulate numerics."""
    x_nhwc = jnp.transpose(x_nchw, (0, 2, 3, 1)).astype(jnp.bfloat16)
    w_hwio = jnp.transpose(w_ochw, (2, 3, 1, 0)).astype(jnp.bfloat16)
    y = lax.conv_general_dilated(
        x_nhwc, w_hwio, window_strides=(1, 1), padding="SAME",
        dimension_numbers=("NHWC", "HWIO", "NHWC"),
        preferred_element_type=jnp.float32)
    y = jnp.maximum(y + b[None, None, None, :].astype(jnp.float32), 0.0)
    return jnp.transpose(y, (0, 3, 1, 2))


if __name__ == "__main__":
    key = jax.random.PRNGKey(0)
    kx, kp = jax.random.split(key)

    # stride=1, in_channels == out_channels -> identity BN branch present.
    N, C, H, W = 2, 128, 16, 16
    x = jax.random.normal(kx, (N, C, H, W), jnp.float32)
    w_fused, b_fused = make_repvgg_params(kp, C, C)

    fwd = jax.jit(repvgg_block_pallas, static_argnames=("block_rows",))
    out = jax.block_until_ready(fwd(x, w_fused, b_fused, block_rows=8))  # grid (2, 2)

    ref = jax.block_until_ready(repvgg_ref(x, w_fused, b_fused))
    assert out.shape == (N, C, H, W)
    max_err = float(jnp.max(jnp.abs(out - ref)))
    assert jnp.allclose(out, ref, atol=1e-2, rtol=1e-2), f"max abs err {max_err}"

    print("KERNEL_OK")
</pallas_src>

<mosaic_0001>
module attributes {stable_mosaic.version = 11 : i64} {
  func.func @_repvgg_tile_kernel(%arg0: i32, %arg1: i32, %arg2: memref<1x18x18x128xbf16, #tpu.memory_space<vmem>>, %arg3: memref<1152x128xbf16, #tpu.memory_space<vmem>>, %arg4: memref<1x128xf32, #tpu.memory_space<vmem>>, %arg5: memref<1x8x16x128xf32, #tpu.memory_space<vmem>>) attributes {dimension_semantics = [#tpu.dimension_semantics<parallel>, #tpu.dimension_semantics<arbitrary>], iteration_bounds = array<i64: 2, 2>, scalar_prefetch = 0 : i64, scratch_operands = 0 : i64, tpu.core_type = #tpu.core_type<tc>, window_params = [{transform_indices = @transform_0, window_bounds = array<i64: 1, 18, 18, 128>}, {pipeline_mode = #tpu.pipeline_mode<synchronous>, transform_indices = @transform_1, window_bounds = array<i64: 1152, 128>}, {pipeline_mode = #tpu.pipeline_mode<synchronous>, transform_indices = @transform_2, window_bounds = array<i64: 1, 128>}, {transform_indices = @transform_3, window_bounds = array<i64: 1, 8, 16, 128>}]} {
    %c8_i32 = arith.constant 8 : i32
    %0 = arith.muli %arg1, %c8_i32 : i32
    %1 = tpu.assume_multiple %0, 8 : i32
    %c0 = arith.constant 0 : index
    %2 = arith.index_cast %1 : i32 to index
    %c0_0 = arith.constant 0 : index
    %c0_1 = arith.constant 0 : index
    %3 = vector.load %arg2[%c0, %2, %c0_0, %c0_1] : memref<1x18x18x128xbf16, #tpu.memory_space<vmem>>, vector<1x10x18x128xbf16>
    %4 = vector.shape_cast %3 : vector<1x10x18x128xbf16> to vector<10x18x128xbf16>
    %5 = vector.extract_strided_slice %4 {offsets = [0, 0, 0], sizes = [8, 16, 128], strides = [1, 1, 1]} : vector<10x18x128xbf16> to vector<8x16x128xbf16>
    %6 = vector.extract_strided_slice %4 {offsets = [0, 1, 0], sizes = [8, 16, 128], strides = [1, 1, 1]} : vector<10x18x128xbf16> to vector<8x16x128xbf16>
    %7 = vector.extract_strided_slice %4 {offsets = [0, 2, 0], sizes = [8, 16, 128], strides = [1, 1, 1]} : vector<10x18x128xbf16> to vector<8x16x128xbf16>
    %8 = vector.extract_strided_slice %4 {offsets = [1, 0, 0], sizes = [8, 16, 128], strides = [1, 1, 1]} : vector<10x18x128xbf16> to vector<8x16x128xbf16>
    %9 = vector.extract_strided_slice %4 {offsets = [1, 1, 0], sizes = [8, 16, 128], strides = [1, 1, 1]} : vector<10x18x128xbf16> to vector<8x16x128xbf16>
    %10 = vector.extract_strided_slice %4 {offsets = [1, 2, 0], sizes = [8, 16, 128], strides = [1, 1, 1]} : vector<10x18x128xbf16> to vector<8x16x128xbf16>
    %11 = vector.extract_strided_slice %4 {offsets = [2, 0, 0], sizes = [8, 16, 128], strides = [1, 1, 1]} : vector<10x18x128xbf16> to vector<8x16x128xbf16>
    %12 = vector.extract_strided_slice %4 {offsets = [2, 1, 0], sizes = [8, 16, 128], strides = [1, 1, 1]} : vector<10x18x128xbf16> to vector<8x16x128xbf16>
    %13 = vector.extract_strided_slice %4 {offsets = [2, 2, 0], sizes = [8, 16, 128], strides = [1, 1, 1]} : vector<10x18x128xbf16> to vector<8x16x128xbf16>
    %14 = tpu.concatenate %5, %6, %7, %8, %9, %10, %11, %12, %13 in 2 : vector<8x16x128xbf16>, vector<8x16x128xbf16>, vector<8x16x128xbf16>, vector<8x16x128xbf16>, vector<8x16x128xbf16>, vector<8x16x128xbf16>, vector<8x16x128xbf16>, vector<8x16x128xbf16>, vector<8x16x128xbf16> -> vector<8x16x1152xbf16>
    %15 = vector.shape_cast %14 : vector<8x16x1152xbf16> to vector<128x1152xbf16>
    %c0_2 = arith.constant 0 : index
    %c0_3 = arith.constant 0 : index
    %16 = vector.load %arg3[%c0_2, %c0_3] : memref<1152x128xbf16, #tpu.memory_space<vmem>>, vector<1152x128xbf16>
    %cst = arith.constant dense<0.000000e+00> : vector<128x128xf32>
    %17 = tpu.matmul %15, %16, %cst {dimension_numbers = #tpu.dot_dimension_numbers<[1], [0], [0], [1], [0, 0, 1, 1], [], []>} : vector<128x1152xbf16>, vector<1152x128xbf16>, vector<128x128xf32> -> vector<128x128xf32>
    %c0_4 = arith.constant 0 : index
    %c0_5 = arith.constant 0 : index
    %18 = vector.load %arg4[%c0_4, %c0_5] : memref<1x128xf32, #tpu.memory_space<vmem>>, vector<1x128xf32>
    %19 = vector.broadcast %18 : vector<1x128xf32> to vector<128x128xf32>
    %20 = arith.addf %17, %19 : vector<128x128xf32>
    %cst_6 = arith.constant 0.000000e+00 : f32
    %21 = vector.broadcast %cst_6 : f32 to vector<128x128xf32>
    %22 = arith.maximumf %20, %21 : vector<128x128xf32>
    %23 = vector.shape_cast %22 : vector<128x128xf32> to vector<8x16x128xf32>
    %c0_7 = arith.constant 0 : index
    %c0_8 = arith.constant 0 : index
    %c0_9 = arith.constant 0 : index
    %c0_10 = arith.constant 0 : index
    %24 = vector.load %arg5[%c0_7, %c0_8, %c0_9, %c0_10] : memref<1x8x16x128xf32, #tpu.memory_space<vmem>>, vector<1x8x16x128xf32>
    %25 = vector.shape_cast %24 : vector<1x8x16x128xf32> to vector<8x16x128xf32>
    %26 = vector.shape_cast %23 : vector<8x16x128xf32> to vector<1x8x16x128xf32>
    tpu.vector_store %arg5[%c0_7, %c0_8, %c0_9, %c0_10], %26 {strides = array<i32>} : memref<1x8x16x128xf32, #tpu.memory_space<vmem>>, vector<1x8x16x128xf32>,
    return
  }
  func.func @transform_0(%arg0: i32, %arg1: i32) -> (i32, i32, i32, i32) {
    %c0_i32 = arith.constant 0 : i32
    %c0_i32_0 = arith.constant 0 : i32
    %c0_i32_1 = arith.constant 0 : i32
    %c0_i32_2 = arith.constant 0 : i32
    return %arg0, %c0_i32, %c0_i32_0, %c0_i32_1 : i32, i32, i32, i32
  }
  func.func @transform_1(%arg0: i32, %arg1: i32) -> (i32, i32) {
    %c0_i32 = arith.constant 0 : i32
    %c0_i32_0 = arith.constant 0 : i32
    %c0_i32_1 = arith.constant 0 : i32
    return %c0_i32, %c0_i32_0 : i32, i32
  }
  func.func @transform_2(%arg0: i32, %arg1: i32) -> (i32, i32) {
    %c0_i32 = arith.constant 0 : i32
    %c0_i32_0 = arith.constant 0 : i32
    %c0_i32_1 = arith.constant 0 : i32
    return %c0_i32, %c0_i32_0 : i32, i32
  }
  func.func @transform_3(%arg0: i32, %arg1: i32) -> (i32, i32, i32, i32) {
    %c0_i32 = arith.constant 0 : i32
    %c0_i32_0 = arith.constant 0 : i32
    %c0_i32_1 = arith.constant 0 : i32
    return %arg0, %arg1, %c0_i32, %c0_i32_0 : i32, i32, i32, i32
  }
}

</mosaic_0001>

<bundles_post_ra>
// kernel: repvgg_block_pallas.1
= control target key start
LH: loop header
LB: loop body
LE: loop exit
PB: predicated region body
PF: predicated region fallthrough
CT: control target
= control target key end

     0   :  { %8 = vsyncpa [#allocation3], 0  ;;  %s3046_s0 = inlined_call_operand.vmem [shape: bf16[2,18,18,128], index: 0, kind: input, shape index: {}]   ;;  %s3047_s1 = inlined_call_operand.vmem [shape: bf16[1152,128], index: 1, kind: input, shape index: {}]   ;;  %s3048_s2 = inlined_call_operand.vmem [shape: f32[1,128], index: 2, kind: input, shape index: {}]   ;;  %s3049_s3 = inlined_call_operand.hbm [shape: f32[2,16,16,128], index: 3, kind: output, shape index: {}]  }
   0x1   :  { %10 = vsyncpa [#allocation3 + $0x1], 0  ;;  %s2393_s12 = smov 0   ;;  %s2395_s13 = smov 0  }
   0x2   :  { %s2397_s14 = smov 0   ;;  %s2399_s15 = smov 0  }
   0x3   :  { %s2401_s16 = smov 0   ;;  %s2403_s17 = smov 0  }
   0x4   :  { %s2405_s18 = smov 0   ;;  %s2407_s19 = smov 0  }
   0x5 LB: > { %s1676_s20 = sadd.s32 4294967295, %s2368_s19   ;;  %s1677_s21 = sadd.s32 4294967294, %s2368_s19   ;;  %s2368_s19 = sphi %s2407_s19, %s16_s19   ;;  %s2364_s18 = sphi %s2405_s18, %s3058_s18   ;;  %s2360_s17 = sphi %s2403_s17, %s3057_s17   ;;  %s2356_s16 = sphi %s2401_s16, %s3056_s16   ;;  %s2352_s15 = sphi %s2399_s15, %s3055_s15   ;;  %s2348_s14 = sphi %s2397_s14, %s3054_s14   ;;  %s2344_s13 = sphi %s2395_s13, %s3053_s13   ;;  %s2340_s12 = sphi %s2393_s12, %s3052_s12  }
   0x6   : > { %s25_s22 = sadd.s32 1, %s2360_s17  ;;  %s28_s23 = sadd.s32 1, %s2364_s18 }
   0x7   : > { %p26_p0 = scmp.ge.s32.totalorder %s25_s22, 2  ;;  %p115_p1 = scmp.ne.s32.totalorder %s2348_s14, %s2344_s13 }
   0x8   : > { %p116_p2 = scmp.eq.s32.totalorder %s1676_s20, 3  ;;  %p121_p5 = scmp.ne.s32.totalorder %s2344_s13, %s2340_s12 }
   0x9   : > { %s3060_s22 = smov (%p26_p0, %s25_s22), 0  ;;  %s3062_s23 = smov (!%p26_p0, %s28_s23), %s2364_s18 }
   0xa   : > { %s101_s24 = ssub.s32 %s2360_s17, %s3060_s22  ;;  %p2444_p3 = por %p116_p2, %p115_p1 }
   0xb   : > { %p30_p4 = scmp.ge.s32.totalorder %s3062_s23, 2  ;;  %p122_p6 = scmp.eq.s32.totalorder %s1677_s21, 3 }
   0xc   : > { %p1680_p7 = scmp.ge.s32.totalorder %s2368_s19, 1  ;;  %p154_p9 = scmp.lt.s32.totalorder %s2368_s19, 5 }
   0xd   : > { %s3064_s23 = smov (%p30_p4, %s3062_s23), 0  ;;  %p2453_p8 = por %p122_p6, %p121_p5 }
   0xe   : > { %s100_s27 = ssub.s32 %s2364_s18, %s3064_s23  ;;  %s105_s28 = sadd.s32 1, %s2348_s14 }
   0xf   : > { %s102_s29 = sor.u32 %s101_s24, %s100_s27  ;;  %p155_p10 = pnand %p1680_p7, %p154_p9 }
  0x10   : > { %p103_p11 = scmp.eq.s32.totalorder %s102_s29, 0  ;;  %v2182_v0 = vld [vmem:[%s3047_s1 + $0x40] sm:$0xff] (!%p155_p10)   ;;  %v2186_v4 = vld [vmem:[%s3047_s1 + $0x48] sm:$0xff] (!%p155_p10)   ;;  %v2190_v8 = vld [vmem:[%s3047_s1 + $0x50] sm:$0xff] (!%p155_p10)   ;;  %p178_p12 = scmp.lt.s32.totalorder (!%p155_p10), %s2356_s16, 1  ;;  %vm396_vm1 = vcmask (!%p155_p10), 1046528  }
  0x11   : > { %158 = sbr.rel (%p155_p10) target bundleno = 422 (0x1a6), region = 32  ;;  %v2183_v1 = vld [vmem:[%s3047_s1 + $0xc0] sm:$0xff] (!%p155_p10)   ;;  %1788 = vmatprep.subr.bf16.mxu0 (!%p155_p10), %v2182_v0  ;;  %v2187_v5 = vld [vmem:[%s3047_s1 + $0xc8] sm:$0xff] (!%p155_p10)   ;;  %v2191_v9 = vld [vmem:[%s3047_s1 + $0xd0] sm:$0xff] (!%p155_p10)   ;;  %vm291_vm0 = vsmask.f32 (!%p155_p10), 7424 }
  0x12   : > { %s2462_s30 = scalar_select %p103_p11, %s2348_s14, %s105_s28  }
  0x13   : > { %v2184_v2 = vld [vmem:[%s3047_s1] sm:$0xff] (!%p155_p10)   ;;  %1852 = vmatprep.subr.bf16.mxu1 (!%p155_p10), %v2183_v1  ;;  %v2188_v6 = vld [vmem:[%s3047_s1 + $0x8] sm:$0xff] (!%p155_p10)   ;;  %v2192_v10 = vld [vmem:[%s3047_s1 + $0x10] sm:$0xff] (!%p155_p10)   ;;  %s1786_s5 = smul.u32 (!%p155_p10), 96, %s2352_s15  ;;  %s1787_s10 = sshll.u32 (!%p155_p10), %s2352_s15, 4 }
  0x14   : > { %v2185_v3 = vld [vmem:[%s3047_s1 + $0x80] sm:$0xff] (!%p155_p10)   ;;  %1789 = vmatpush3.bf16.msra.mxu0 (!%p155_p10), %v2184_v2  ;;  %v2189_v7 = vld [vmem:[%s3047_s1 + $0x88] sm:$0xff] (!%p155_p10)   ;;  %v2193_v11 = vld [vmem:[%s3047_s1 + $0x90] sm:$0xff] (!%p155_p10)   ;;  %s1782_s20 = sshll.u32 (!%p155_p10), %s2356_s16, 5 }
  0x15   : > { %1853 = vmatpush3.bf16.msra.mxu1 (!%p155_p10), %v2185_v3  ;;  %1790 = vmatprep.subr.bf16.mxu0 (!%p155_p10), %v2186_v4  ;;  %v2194_v12 = vld [vmem:[%s3047_s1 + $0x58] sm:$0xff] (!%p155_p10)   ;;  %v2198_v16 = vld [vmem:[%s3047_s1 + $0x60] sm:$0xff] (!%p155_p10)   ;;  %v2202_v20 = vld [vmem:[%s3047_s1 + $0x68] sm:$0xff] (!%p155_p10)   ;;  %s1595_s21 = sadd.s32 (!%p155_p10), %s1787_s10, %s1782_s20 }
  0x16   : > { %1854 = vmatprep.subr.bf16.mxu1 (!%p155_p10), %v2187_v5  ;;  %v2195_v13 = vld [vmem:[%s3047_s1 + $0xd8] sm:$0xff] (!%p155_p10)   ;;  %v2199_v17 = vld [vmem:[%s3047_s1 + $0xe0] sm:$0xff] (!%p155_p10)   ;;  %v2203_v21 = vld [vmem:[%s3047_s1 + $0xe8] sm:$0xff] (!%p155_p10)   ;;  %s1783_s15 = sshll.u32 (!%p155_p10), %s1595_s21, 7 }
  0x17   : > { %v2196_v14 = vld [vmem:[%s3047_s1 + $0x18] sm:$0xff] (!%p155_p10)   ;;  %v2200_v18 = vld [vmem:[%s3047_s1 + $0x20] sm:$0xff] (!%p155_p10)   ;;  %v2204_v22 = vld [vmem:[%s3047_s1 + $0x28] sm:$0xff] (!%p155_p10)   ;;  %s2985_s29 = scalar_lea.hbm (!%p155_p10), %s3049_s3, %s1783_s15 }
  0x18   : > { %1791 = vmatpush3.bf16.msra.mxu0 %v2188_v6  ;;  %v2197_v15 = vld [vmem:[%s3047_s1 + $0x98] sm:$0xff]   ;;  %v2201_v19 = vld [vmem:[%s3047_s1 + $0xa0] sm:$0xff]   ;;  %s179_s28 = scalar_select %p178_p12, %s2356_s16, 1  ;;  %v2205_v23 = vld [vmem:[%s3047_s1 + $0xa8] sm:$0xff]  }
  0x19   : > { %1855 = vmatpush3.bf16.msra.mxu1 %v2189_v7  ;;  %1792 = vmatprep.subr.bf16.mxu0 %v2190_v8  ;;  %v2206_v24 = vld [vmem:[%s3047_s1 + $0x70] sm:$0xff]   ;;  %v2210_v28 = vld [vmem:[%s3047_s1 + $0x78] sm:$0xff]   ;;  %v2217_v40 = vld [vmem:[%s3047_s1 + $0x140] sm:$0xff]  }
  0x1a   : > { %1856 = vmatprep.subr.bf16.mxu1 %v2191_v9  ;;  %s2108_s11 = smul.u32 216, %s179_s28  ;;  %v2207_v25 = vld [vmem:[%s3047_s1 + $0xf0] sm:$0xff]   ;;  %v2211_v29 = vld [vmem:[%s3047_s1 + $0xf8] sm:$0xff]   ;;  %v2218_v43 = vld [vmem:[%s3047_s1 + $0x1c0] sm:$0xff]   ;;  %s175_s28 = sand.u32 1, %s2344_s13  }
  0x1b   : > { %v2208_v26 = vld [vmem:[%s3047_s1 + $0x30] sm:$0xff]   ;;  %v2212_v30 = vld [vmem:[%s3047_s1 + $0x38] sm:$0xff]   ;;  %v2219_v45 = vld [vmem:[%s3047_s1 + $0x100] sm:$0xff]   ;;  %s1681_s8 = sshll.u32 %s175_s28, 7 }
  0x1c   : > { %1793 = vmatpush3.bf16.msra.mxu0 %v2192_v10  ;;  %v2209_v27 = vld [vmem:[%s3047_s1 + $0xb0] sm:$0xff]   ;;  %s182_s9 = scalar_lea.vmem %s3046_s0, %s2108_s11  ;;  %v2213_v31 = vld [vmem:[%s3047_s1 + $0xb8] sm:$0xff]   ;;  %v2220_v47 = vld [vmem:[%s3047_s1 + $0x180] sm:$0xff]   ;;  %s2994_s11 = scalar_lea.sflag [#allocation3], %s175_s28 }
  0x1d   : > { %1857 = vmatpush3.bf16.msra.mxu1 %v2193_v11  ;;  %1794 = vmatprep.subr.bf16.mxu0 %v2194_v12  ;;  %s2563_s4 = scalar_lea.vmem %s182_s9, %s1786_s5  ;;  %v2223_v57 = vld [vmem:[%s3047_s1 + $0x148] sm:$0xff]   ;;  %v2229_v10 = vld [vmem:[%s3047_s1 + $0x150] sm:$0xff]   ;;  %s2957_s9 = scalar_lea.vmem [#allocation2], %s1681_s8 }
  0x1e   : > { %1858 = vmatprep.subr.bf16.mxu1 %v2195_v13  ;;  %v2214_v32 = vld [vmem:[%s2563_s4] sm:$0xff]   ;;  %v2215_v33 = vld [vmem:[%s2563_s4 + $0x8] ss:$0 sps:$4 sm:$0x11]   ;;  %v2216_v34 = vld [vmem:[%s2563_s4 + $0xc] sm:$0xff]   ;;  %s1598_s16 = sshll.u32 %s2957_s9, 4  ;;  %s2987_s16 = int_to_ptr.vmem [resolvable:$true] %s1598_s16 }
  0x1f   : > { %v293_v35 = vshrl.u32 %v2214_v32, 16  ;;  %v295_v36 = vshll.u32 %v2214_v32, 16  ;;  %v300_v37 = vshll.u32 %v2215_v33, 16  ;;  %v397_v38 = vrot.slane %v2214_v32, 1  ;;  %1193 = vmatprep.mubr.bf16.mxu1 %v2216_v34  ;;  %v2587_v52 = vld [vmem:[%s2563_s4 + $0x18] sm:$0xff]   ;;  %v2224_v58 = vld [vmem:[%s3047_s1 + $0x1c8] sm:$0xff]  }
  0x20   : > { %1795 = vmatpush3.bf16.msra.mxu0 %v2196_v14  ;;  %v398_v39 = vrot.slane %v2215_v33, 1  ;;  %v305_v48 = vshrl.u32 %v2216_v34, 16  ;;  %v2221_v49 = vld [vmem:[%s2563_s4 + $0x14] ss:$0 sps:$4 sm:$0x11]   ;;  %v307_v50 = vshll.u32 %v2216_v34, 16 }
  0x21   : > { %1859 = vmatpush3.bf16.msra.mxu1 %v2197_v15  ;;  %1796 = vmatprep.subr.bf16.mxu0 %v2198_v16  ;;  %v297_v41 = vrot.slane %v295_v36, 1  ;;  %v302_v42 = vrot.slane %v300_v37, 1  ;;  %v400_v53 = vrot.slane %v2216_v34, 1  ;;  %v312_v55 = vshll.u32 %v2221_v49, 16  ;;  %v2225_v63 = vld [vmem:[%s3047_s1 + $0x108] sm:$0xff]   ;;  %v2230_v13 = vld [vmem:[%s3047_s1 + $0x1d0] sm:$0xff]  }
  0x22   : > { %1860 = vmatprep.subr.bf16.mxu1 %v2199_v17  ;;  %v399_v44 = vsel %vm396_vm1, %v397_v38, %v398_v39  ;;  %v309_v54 = vrot.slane %v307_v50, 1  ;;  %v401_v56 = vrot.slane %v2221_v49, 1  ;;  %v317_v59 = vshrl.u32 %v2587_v52, 16  ;;  %v2226_v0 = vld [vmem:[%s3047_s1 + $0x188] sm:$0xff]   ;;  %v2231_v14 = vld [vmem:[%s3047_s1 + $0x110] sm:$0xff]   ;;  %s2274_s6 = scalar_lea.vmem %s2987_s16, 2048 }
  0x23   : > { %v298_v46 = vor.u32 %v297_v41, %v293_v35  ;;  %v314_v61 = vrot.slane %v312_v55, 1  ;;  %v319_v1 = vshll.u32 %v2587_v52, 16  ;;  %v2227_v3 = vld [vmem:[%s2563_s4 + $0x20] ss:$0 sps:$4 sm:$0x11]   ;;  %v2612_v4 = vld [vmem:[%s2563_s4 + $0x24] sm:$0xff]   ;;  %p2275_p13 = scmp.ne.s32.totalorder %s2987_s16, %s2274_s6 }
  0x24   : > { %1797 = vmatpush3.bf16.msra.mxu0 %v2200_v18  ;;  %v310_v60 = vor.u32 %v309_v54, %v305_v48  ;;  %v2598_v62 = vsel %vm396_vm1, %v400_v53, %v401_v56  ;;  %v403_v6 = vrot.slane %v2587_v52, 1  ;;  %v324_v7 = vshll.u32 %v2227_v3, 16  ;;  %v2232_v18 = vld [vmem:[%s3047_s1 + $0x190] sm:$0xff]   ;;  %v2239_v33 = vld [vmem:[%s2563_s4 + $0x38] ss:$0 sps:$4 sm:$0x11]  }
  0x25   : > { %1861 = vmatpush3.bf16.msra.mxu1 %v2201_v19  ;;  %1798 = vmatprep.subr.bf16.mxu0 %v2202_v20  ;;  %v303_v51 = vsel %vm291_vm0, %v298_v46, %v302_v42  ;;  %v321_v5 = vrot.slane %v319_v1, 1  ;;  %v404_v8 = vrot.slane %v2227_v3, 1  ;;  %v329_v11 = vshrl.u32 %v2612_v4, 16  ;;  %v2233_v19 = vld [vmem:[%s2563_s4 + $0x2c] ss:$0 sps:$4 sm:$0x11]   ;;  %p2276_p0 = pnand %p2275_p13, %p2444_p3 }
  0x26   : > { %1862 = vmatprep.subr.bf16.mxu1 %v2203_v21  ;;  %1096 = vmatprep.mubr.bf16.mxu0 %v303_v51  ;;  %v2608_v2 = vsel %vm291_vm0, %v310_v60, %v314_v61  ;;  %v326_v12 = vrot.slane %v324_v7, 1  ;;  %v331_v15 = vshll.u32 %v2612_v4, 16  ;;  %v2641_v21 = vld [vmem:[%s2563_s4 + $0x30] sm:$0xff]   ;;  %v2666_v35 = vld [vmem:[%s2563_s4 + $0x3c] sm:$0xff]   ;;  %v348_v37 = vshll.u32 %v2239_v33, 16  ;;  %v2694_v53 = vld [vmem:[%s2563_s4 + $0x48] sm:$0xff]  }
  0x27   : > { %v322_v9 = vor.u32 %v321_v5, %v317_v59  ;;  %v2633_v17 = vsel %vm396_vm1, %v403_v6, %v404_v8  ;;  %v409_v38 = vrot.slane %v2641_v21, 1  ;;  %v410_v39 = vrot.slane %v2239_v33, 1  ;;  %v2242_v42 = vld [vmem:[%s3047_s1 + $0x1e0] sm:$0xff]   ;;  %v2247_v55 = vld [vmem:[%s3047_s1 + $0x168] sm:$0xff]   ;;  %v2720_v6 = vld [vmem:[%s2563_s4 + $0x54] sm:$0xff]   ;;  %p2277_p1 = pneg %p2276_p0  ;;  %s2370_s5 = smov [#allocation2]  }
  0x28   : > { %1799 = vmatpush3.bf16.msra.mxu0 %v2204_v22  ;;  %v333_v20 = vrot.slane %v331_v15, 1  ;;  %v336_v22 = vshll.u32 %v2233_v19, 16  ;;  %v2244_v46 = vld [vmem:[%s3047_s1 + $0x1a0] sm:$0xff]   ;;  %v353_v49 = vshrl.u32 %v2666_v35, 16  ;;  %v355_v50 = vshll.u32 %v2666_v35, 16  ;;  %v2249_v61 = vld [vmem:[%s3047_s1 + $0x128] sm:$0xff]  }
  0x29   : > { %1863 = vmatpush3.bf16.msra.mxu1 %v2205_v23  ;;  %1800 = vmatprep.subr.bf16.mxu0 %v2206_v24  ;;  %v2630_v16 = vsel %vm291_vm0, %v322_v9, %v326_v12  ;;  %v406_v23 = vrot.slane %v2612_v4, 1  ;;  %v407_v24 = vrot.slane %v2233_v19, 1  ;;  %v2702_v56 = vsel %vm396_vm1, %v409_v38, %v410_v39  ;;  %v2251_v3 = vld [vmem:[%s2563_s4 + $0x50] ss:$0 sps:$4 sm:$0x11]   ;;  %v2262_v33 = vld [vmem:[%s3047_s1 + $0x1b8] sm:$0xff]  }
  0x2a   : > { %1864 = vmatprep.subr.bf16.mxu1 %v2207_v25  ;;  %v2235_v25 = vld [vmem:[%s3047_s1 + $0x158] sm:$0xff]   ;;  %v357_v54 = vrot.slane %v355_v50, 1  ;;  %v365_v5 = vshrl.u32 %v2694_v53, 16  ;;  %v372_v9 = vshll.u32 %v2251_v3, 16  ;;  %v2255_v12 = vld [vmem:[%s3047_s1 + $0x130] sm:$0xff]  }
  0x2b   : > { %v2670_v36 = vsel %vm396_vm1, %v406_v23, %v407_v24  ;;  %v2256_v15 = vld [vmem:[%s3047_s1 + $0x1b0] sm:$0xff]   ;;  %v2257_v19 = vld [vmem:[%s2563_s4 + $0x5c] ss:$0 sps:$4 sm:$0x11]   ;;  %v416_v23 = vrot.slane %v2251_v3, 1  ;;  %v377_v24 = vshrl.u32 %v2720_v6, 16 }
  0x2c   : > { %1801 = vmatpush3.bf16.msra.mxu0 %v2208_v26  ;;  %v334_v26 = vor.u32 %v333_v20, %v329_v11  ;;  %v358_v59 = vor.u32 %v357_v54, %v353_v49  ;;  %v2254_v11 = vld [vmem:[%s3047_s1 + $0x1f0] sm:$0xff]   ;;  %v379_v20 = vshll.u32 %v2720_v6, 16 }
  0x2d   : > { %1865 = vmatpush3.bf16.msra.mxu1 %v2209_v27  ;;  %1802 = vmatprep.subr.bf16.mxu0 %v2210_v28  ;;  %v338_v27 = vrot.slane %v336_v22, 1  ;;  %v2236_v28 = vld [vmem:[%s3047_s1 + $0x1d8] sm:$0xff]   ;;  %v415_v22 = vrot.slane %v2694_v53, 1 }
  0x2e   : > { %1866 = vmatprep.subr.bf16.mxu1 %v2211_v29  ;;  %v2237_v29 = vld [vmem:[%s3047_s1 + $0x118] sm:$0xff]  }
  0x2f   : > { %v2773_v38 = vsel %vm396_vm1, %v415_v22, %v416_v23 }
  0x30   : > { %1803 = vmatpush3.bf16.msra.mxu0 %v2212_v30  ;;  %v341_v30 = vshrl.u32 %v2641_v21, 16 }
  0x31   : > { %1867 = vmatpush3.bf16.msra.mxu1 %v2213_v31  ;;  %1916 = vmatprep.subr.bf16.mxu0 %v2217_v40  ;;  %v2657_v31 = vsel %vm291_vm0, %v334_v26, %v338_v27  ;;  %v2241_v40 = vld [vmem:[%s3047_s1 + $0x160] sm:$0xff]   ;;  %v2259_v26 = vld [vmem:[%s3047_s1 + $0x178] sm:$0xff]   ;;  %v381_v27 = vrot.slane %v379_v20, 1 }
  0x32   : > { %1980 = vmatprep.subr.bf16.mxu1 %v2218_v43  ;;  %v350_v43 = vrot.slane %v348_v37, 1 }
  0x33   : > { %1097 = vmatmul.mubr.bf16.vlgmr.msra.gmra.mrb[0].mxu0 %v2214_v32  ;;  %v2238_v32 = vld [vmem:[%s3047_s1 + $0x198] sm:$0xff]   ;;  %v382_v39 = vor.u32 %v381_v27, %v377_v24 }
  0x34   : > { %1194 = vmatmul.mubr.bf16.vlgmr.msra.gmra.mrb[0].mxu1 %v399_v44  ;;  %1917 = vmatpush3.bf16.msra.mxu0 %v2219_v45  ;;  %v2243_v44 = vld [vmem:[%s3047_s1 + $0x120] sm:$0xff]  }
  0x35   : > { %1981 = vmatpush3.bf16.msra.mxu1 %v2220_v47  ;;  %1201 = vmatprep.mubr.bf16.mxu1 %v2587_v52  ;;  %v2245_v47 = vld [vmem:[%s2563_s4 + $0x44] ss:$0 sps:$4 sm:$0x11]  }
  0x36   : > { %1918 = vmatprep.subr.bf16.mxu0 %v2223_v57  ;;  %1982 = vmatprep.subr.bf16.mxu1 %v2224_v58  ;;  %v360_v51 = vshll.u32 %v2245_v47, 16  ;;  %v412_v57 = vrot.slane %v2666_v35, 1  ;;  %v2248_v58 = vld [vmem:[%s3047_s1 + $0x1e8] sm:$0xff]   ;;  %v413_v1 = vrot.slane %v2245_v47, 1 }
  0x37   : > { %1104 = vmatprep.mubr.bf16.mxu0 %v2608_v2 }
  0x38   : > { %1919 = vmatpush3.bf16.msra.mxu0 %v2225_v63  ;;  %v362_v60 = vrot.slane %v360_v51, 1  ;;  %v2250_v63 = vld [vmem:[%s3047_s1 + $0x1a8] sm:$0xff]  }
  0x39   : > { %1983 = vmatpush3.bf16.msra.mxu1 %v2226_v0  ;;  %1920 = vmatprep.subr.bf16.mxu0 %v2229_v10  ;;  %v367_v0 = vshll.u32 %v2694_v53, 16  ;;  %v2253_v10 = vld [vmem:[%s3047_s1 + $0x170] sm:$0xff]  }
  0x3a   : > { %1984 = vmatprep.subr.bf16.mxu1 %v2230_v13  ;;  %v2723_v7 = vsel %vm291_vm0, %v358_v59, %v362_v60  ;;  %v2737_v13 = vsel %vm396_vm1, %v412_v57, %v413_v1  ;;  %v2272_v57 = vld [vmem:[%s2563_s4 + $0x74] ss:$0 sps:$4 sm:$0x11]  }
  0x3b   : > { %1105 = vmatmul.mubr.bf16.gmra.mrb[4].mxu0 %v2216_v34  ;;  %v343_v34 = vshll.u32 %v2641_v21, 16  ;;  %v369_v8 = vrot.slane %v367_v0, 1  ;;  %v478_v3 = vrot.slane %v2272_v57, 1 }
  0x3c   : > { %1202 = vmatmul.mubr.bf16.gmra.mrb[4].mxu1 %v2598_v62  ;;  %1112 = vmatprep.mubr.bf16.mxu0 %v2630_v16 }
  0x3d   : > { %1209 = vmatprep.mubr.bf16.mxu1 %v2612_v4  ;;  %1921 = vmatpush3.bf16.msra.mxu0 %v2231_v14  ;;  %v345_v41 = vrot.slane %v343_v34, 1  ;;  %v374_v14 = vrot.slane %v372_v9, 1  ;;  %v2263_v34 = vld [vmem:[%s3047_s1 + $0x200] sm:$0xff]  }
  0x3e   : > { %1985 = vmatpush3.bf16.msra.mxu1 %v2232_v18  ;;  %1922 = vmatprep.subr.bf16.mxu0 %v2235_v25  ;;  %v370_v18 = vor.u32 %v369_v8, %v365_v5  ;;  %v2748_v25 = vld [vmem:[%s2563_s4 + $0x60] sm:$0xff]  }
  0x3f   : > { %1986 = vmatprep.subr.bf16.mxu1 %v2236_v28  ;;  %v346_v45 = vor.u32 %v345_v41, %v341_v30  ;;  %v2260_v28 = vld [vmem:[%s3047_s1 + $0x1f8] sm:$0xff]   ;;  %v384_v30 = vshll.u32 %v2257_v19, 16  ;;  %v441_v37 = vshll.u32 %v2748_v25, 16  ;;  %v439_v41 = vshrl.u32 %v2748_v25, 16 }
  0x40   : > { %v451_v47 = vrot.slane %v2748_v25, 1 }
  0x41   : > { %1923 = vmatpush3.bf16.msra.mxu0 %v2237_v29  ;;  %v2689_v48 = vsel %vm291_vm0, %v346_v45, %v350_v43  ;;  %v2758_v29 = vsel %vm291_vm0, %v370_v18, %v374_v14  ;;  %v418_v43 = vrot.slane %v2720_v6, 1  ;;  %v2265_v14 = vld [vmem:[%s3047_s1 + $0x210] sm:$0xff]  }
  0x42   : > { %1987 = vmatpush3.bf16.msra.mxu1 %v2238_v32  ;;  %1924 = vmatprep.subr.bf16.mxu0 %v2241_v40  ;;  %v2261_v32 = vld [vmem:[%s3047_s1 + $0x138] sm:$0xff]   ;;  %v386_v40 = vrot.slane %v384_v30, 1 }
  0x43   : > { %1113 = vmatmul.mubr.bf16.gmra.mrb[8].mxu0 %v2587_v52  ;;  %1988 = vmatprep.subr.bf16.mxu1 %v2242_v42  ;;  %v443_v42 = vrot.slane %v441_v37, 1 }
  0x44   : > { %1210 = vmatmul.mubr.bf16.gmra.mrb[8].mxu1 %v2633_v17  ;;  %1120 = vmatprep.mubr.bf16.mxu0 %v2657_v31  ;;  %v2780_v45 = vsel %vm291_vm0, %v382_v39, %v386_v40 }
  0x45   : > { %1217 = vmatprep.mubr.bf16.mxu1 %v2641_v21  ;;  %1925 = vmatpush3.bf16.msra.mxu0 %v2243_v44  ;;  %v419_v44 = vrot.slane %v2257_v19, 1  ;;  %v444_v49 = vor.u32 %v443_v42, %v439_v41 }
  0x46   : > { %1989 = vmatpush3.bf16.msra.mxu1 %v2244_v46  ;;  %1926 = vmatprep.subr.bf16.mxu0 %v2247_v55  ;;  %v2269_v46 = vld [vmem:[%s2563_s4 + $0x68] ss:$0 sps:$4 sm:$0x11]   ;;  %v2790_v55 = vld [vmem:[%s2563_s4 + $0x6c] sm:$0xff]   ;;  %s2278_s4 = sshll.u32 %s2370_s5, 4  ;;  %s2279_s4 = int_to_ptr.vmem [resolvable:$false] %s2278_s4 }
  0x47   : > { %1990 = vmatprep.subr.bf16.mxu1 %v2248_v58  ;;  %v446_v50 = vshll.u32 %v2269_v46, 16  ;;  %v452_v51 = vrot.slane %v2269_v46, 1  ;;  %v2787_v54 = vsel %vm396_vm1, %v418_v43, %v419_v44  ;;  %v465_v60 = vshrl.u32 %v2790_v55, 16  ;;  %s2280_s7 = scalar_lea.vmem %s2279_s4, 4096  ;;  %p2281_p2 = scmp.lt.s32.totalorder %s2987_s16, %s2279_s4 }
  0x48   : > { %v477_v0 = vrot.slane %v2790_v55, 1  ;;  %p2282_p4 = scmp.lt.s32.totalorder %s2280_s7, %s2274_s6 }
  0x49   : > { %1927 = vmatpush3.bf16.msra.mxu0 %v2249_v61  ;;  %v448_v58 = vrot.slane %v446_v50, 1  ;;  %v2794_v59 = vsel %vm396_vm1, %v451_v47, %v452_v51  ;;  %v467_v61 = vshll.u32 %v2790_v55, 16 }
  0x4a   : > { %1991 = vmatpush3.bf16.msra.mxu1 %v2250_v63  ;;  %1928 = vmatprep.subr.bf16.mxu0 %v2253_v10  ;;  %v472_v63 = vshll.u32 %v2272_v57, 16  ;;  %v2805_v9 = vsel %vm396_vm1, %v477_v0, %v478_v3  ;;  %p2283_p5 = por %p2282_p4, %p2281_p2 }
  0x4b   : > { %1121 = vmatmul.mubr.bf16.gmra.mrb[12].mxu0 %v2612_v4  ;;  %1992 = vmatprep.subr.bf16.mxu1 %v2254_v11  ;;  %v2801_v1 = vsel %vm291_vm0, %v444_v49, %v448_v58  ;;  %v469_v5 = vrot.slane %v467_v61, 1 }
  0x4c   : > { %1218 = vmatmul.mubr.bf16.gmra.mrb[12].mxu1 %v2670_v36  ;;  %1128 = vmatprep.mubr.bf16.mxu0 %v2689_v48  ;;  %v474_v8 = vrot.slane %v472_v63, 1  ;;  %p2284_p6 = pnand %p2283_p5, %p2277_p1 }
  0x4d   : > { %1225 = vmatprep.mubr.bf16.mxu1 %v2666_v35  ;;  %1929 = vmatpush3.bf16.msra.mxu0 %v2255_v12  ;;  %v470_v10 = vor.u32 %v469_v5, %v465_v60  ;;  %v2264_v12 = vld [vmem:[%s3047_s1 + $0x208] sm:$0xff]  }
  0x4e   : > { %1993 = vmatpush3.bf16.msra.mxu1 %v2256_v15  ;;  %1930 = vmatprep.subr.bf16.mxu0 %v2259_v26 }
  0x4f   : > { %1994 = vmatprep.subr.bf16.mxu1 %v2260_v28  ;;  %v475_v11 = vsel %vm291_vm0, %v470_v10, %v474_v8 }
  0x51   : > { %1931 = vmatpush3.bf16.msra.mxu0 %v2261_v32 }
  0x52   : > { %1995 = vmatpush3.bf16.msra.mxu1 %v2262_v33  ;;  %2060 = vmatprep.subr.bf16.mxu0 %v2263_v34 }
  0x53   : > { %1129 = vmatmul.mubr.bf16.gmra.mrb[16].mxu0 %v2641_v21  ;;  %2092 = vmatprep.subr.bf16.mxu1 %v2263_v34 }
  0x54   : > { %1226 = vmatmul.mubr.bf16.gmra.mrb[16].mxu1 %v2702_v56  ;;  %1136 = vmatprep.mubr.bf16.mxu0 %v2723_v7 }
  0x55   : > { %1233 = vmatprep.mubr.bf16.mxu1 %v2694_v53 }
  0x5b   : > { %1137 = vmatmul.mubr.bf16.gmra.mrb[20].mxu0 %v2666_v35 }
  0x5c   : > { %1234 = vmatmul.mubr.bf16.gmra.mrb[20].mxu1 %v2737_v13  ;;  %1144 = vmatprep.mubr.bf16.mxu0 %v2758_v29 }
  0x5d   : > { %1241 = vmatprep.mubr.bf16.mxu1 %v2720_v6 }
  0x63   : > { %1145 = vmatmul.mubr.bf16.gmra.mrb[24].mxu0 %v2694_v53 }
  0x64   : > { %1242 = vmatmul.mubr.bf16.gmra.mrb[24].mxu1 %v2773_v38  ;;  %1152 = vmatprep.mubr.bf16.mxu0 %v2780_v45 }
  0x65   : > { %1249 = vmatprep.mubr.bf16.mxu1 %v2748_v25 }
  0x6b   : > { %1153 = vmatmul.mubr.bf16.gmra.mrb[28].mxu0 %v2720_v6 }
  0x6c   : > { %1250 = vmatmul.mubr.bf16.gmra.mrb[28].mxu1 %v2787_v54  ;;  %1290 = vmatprep.mubr.bf16.mxu0 %v2598_v62  ;;  %v2267_v62 = vld [vmem:[%s3047_s1 + $0x220] sm:$0xff]  }
  0x6d   : > { %1387 = vmatprep.mubr.bf16.mxu1 %v2630_v16 }
  0x73   : > { %1291 = vmatmul.mubr.bf16.vlgmr.msra.gmra.mrb[32].mxu0 %v2608_v2  ;;  %v2268_v2 = vld [vmem:[%s3047_s1 + $0x228] sm:$0xff]  }
  0x74   : > { %1388 = vmatmul.mubr.bf16.vlgmr.msra.gmra.mrb[32].mxu1 %v2587_v52  ;;  %2061 = vmatpush3.bf16.msra.mxu0 %v2263_v34  ;;  %v2266_v52 = vld [vmem:[%s3047_s1 + $0x218] sm:$0xff]  }
  0x75   : > { %2100 = vmatpush3.bf16.msra.mxu1 %v2263_v34  ;;  %1395 = vmatprep.mubr.bf16.mxu1 %v2657_v31 }
  0x76   : > { %2093 = vmatprep.subr.bf16.mxu1 %v2264_v12  ;;  %1298 = vmatprep.mubr.bf16.mxu0 %v2633_v17 }
  0x77   : > { %2062 = vmatprep.subr.bf16.mxu0 %v2264_v12 }
  0x78   : > { %2063 = vmatpush3.bf16.msra.mxu0 %v2264_v12 }
  0x79   : > { %2101 = vmatpush3.bf16.msra.mxu1 %v2264_v12  ;;  %2064 = vmatprep.subr.bf16.mxu0 %v2265_v14 }
  0x7a   : > { %2094 = vmatprep.subr.bf16.mxu1 %v2265_v14 }
  0x7b   : > { %1299 = vmatmul.mubr.bf16.gmra.mrb[36].mxu0 %v2630_v16  ;;  %v2273_v16 = vld [vmem:[%s3047_s1 + $0x238] sm:$0xff]  }
  0x7c   : > { %1396 = vmatmul.mubr.bf16.gmra.mrb[36].mxu1 %v2612_v4  ;;  %1306 = vmatprep.mubr.bf16.mxu0 %v2670_v36  ;;  %v2270_v4 = vld [vmem:[%s3047_s1 + $0x230] sm:$0xff]  }
  0x7d   : > { %1403 = vmatprep.mubr.bf16.mxu1 %v2689_v48  ;;  %2102 = vmatpush3.bf16.msra.mxu1 %v2265_v14 }
  0x7e   : > { %2095 = vmatprep.subr.bf16.mxu1 %v2266_v52  ;;  %2065 = vmatpush3.bf16.msra.mxu0 %v2265_v14 }
  0x7f   : > { %2066 = vmatprep.subr.bf16.mxu0 %v2266_v52 }
  0x81   : > { %2103 = vmatpush3.bf16.msra.mxu1 %v2266_v52 }
  0x82   : > { %2096 = vmatprep.subr.bf16.mxu1 %v2267_v62  ;;  %2067 = vmatpush3.bf16.msra.mxu0 %v2266_v52 }
  0x83   : > { %2068 = vmatprep.subr.bf16.mxu0 %v2267_v62  ;;  %1307 = vmatmul.mubr.bf16.gmra.mrb[40].mxu0 %v2657_v31 }
  0x84   : > { %1404 = vmatmul.mubr.bf16.gmra.mrb[40].mxu1 %v2641_v21  ;;  %1314 = vmatprep.mubr.bf16.mxu0 %v2702_v56 }
  0x85   : > { %1411 = vmatprep.mubr.bf16.mxu1 %v2723_v7  ;;  %2104 = vmatpush3.bf16.msra.mxu1 %v2267_v62 }
  0x86   : > { %2097 = vmatprep.subr.bf16.mxu1 %v2268_v2  ;;  %2069 = vmatpush3.bf16.msra.mxu0 %v2267_v62 }
  0x87   : > { %2070 = vmatprep.subr.bf16.mxu0 %v2268_v2 }
  0x89   : > { %2105 = vmatpush3.bf16.msra.mxu1 %v2268_v2 }
  0x8a   : > { %2098 = vmatprep.subr.bf16.mxu1 %v2270_v4  ;;  %2071 = vmatpush3.bf16.msra.mxu0 %v2268_v2 }
  0x8b   : > { %2072 = vmatprep.subr.bf16.mxu0 %v2270_v4  ;;  %1315 = vmatmul.mubr.bf16.gmra.mrb[44].mxu0 %v2689_v48 }
  0x8c   : > { %1412 = vmatmul.mubr.bf16.gmra.mrb[44].mxu1 %v2666_v35  ;;  %1322 = vmatprep.mubr.bf16.mxu0 %v2737_v13 }
  0x8d   : > { %1419 = vmatprep.mubr.bf16.mxu1 %v2758_v29  ;;  %2106 = vmatpush3.bf16.msra.mxu1 %v2270_v4 }
  0x8e   : > { %2099 = vmatprep.subr.bf16.mxu1 %v2273_v16  ;;  %2073 = vmatpush3.bf16.msra.mxu0 %v2270_v4 }
  0x8f   : > { %2074 = vmatprep.subr.bf16.mxu0 %v2273_v16 }
  0x91   : > { %2107 = vmatpush3.bf16.msra.mxu1 %v2273_v16 }
  0x92   : > { %2075 = vmatpush3.bf16.msra.mxu0 %v2273_v16 }
  0x93   : > { %1323 = vmatmul.mubr.bf16.gmra.mrb[48].mxu0 %v2723_v7 }
  0x94   : > { %1420 = vmatmul.mubr.bf16.gmra.mrb[48].mxu1 %v2694_v53  ;;  %1330 = vmatprep.mubr.bf16.mxu0 %v2773_v38 }
  0x95   : > { %1427 = vmatprep.mubr.bf16.mxu1 %v2780_v45 }
  0x9b   : > { %1331 = vmatmul.mubr.bf16.gmra.mrb[52].mxu0 %v2758_v29 }
  0x9c   : > { %1428 = vmatmul.mubr.bf16.gmra.mrb[52].mxu1 %v2720_v6  ;;  %1338 = vmatprep.mubr.bf16.mxu0 %v2787_v54 }
  0x9d   : > { %1435 = vmatprep.mubr.bf16.mxu1 %v2801_v1 }
  0xa3   : > { %1339 = vmatmul.mubr.bf16.gmra.mrb[56].mxu0 %v2780_v45 }
  0xa4   : > { %1436 = vmatmul.mubr.bf16.gmra.mrb[56].mxu1 %v2748_v25  ;;  %1346 = vmatprep.mubr.bf16.mxu0 %v2794_v59 }
  0xa5   : > { %1443 = vmatprep.mubr.bf16.mxu1 %v475_v11 }
  0xab   : > { %1347 = vmatmul.mubr.bf16.gmra.mrb[60].mxu0 %v2801_v1 }
  0xac   : > { %1444 = vmatmul.mubr.bf16.gmra.mrb[60].mxu1 %v2790_v55  ;;  %2076 = vmatprep.mubr.bf16.mxu0 %v2633_v17  ;;  %v2871_v17 = vld [vmem:[%s3048_s2] ss:$0 sm:$0xff] }
  0xad   : > { %2084 = vmatprep.mubr.bf16.mxu1 %v2773_v38 }
  0xb3   : > { %2077 = vmatmul.mubr.bf16.vlgmr.msra.gmra.mrb[64].mxu0 %v2670_v36 }
  0xb4   : > { %2085 = vmatmul.mubr.bf16.vlgmr.msra.gmra.mrb[64].mxu1 %v2787_v54  ;;  %2080 = vmatprep.mubr.bf16.mxu0 %v2702_v56 }
  0xb5   : > { %2088 = vmatprep.mubr.bf16.mxu1 %v2794_v59 }
  0xbb   : > { %2081 = vmatmul.mubr.bf16.gmra.mrb[68].mxu0 %v2737_v13 }
  0xbc   : > { %2089 = vmatmul.mubr.bf16.gmra.mrb[68].mxu1 %v2805_v9 }
 0x106   : > { %v1804_v6 = vpop.f32.mrb[0].mxu0 }
 0x107   : > { %v1868_v21 = vpop.f32.mrb[0].mxu1  ;;  %v1805_v15 = vpop.f32.mrb[1].mxu0 }
 0x108   : > { %v1869_v31 = vpop.f32.mrb[1].mxu1  ;;  %v1806_v36 = vadd.f32 %v1805_v15, %v1804_v6  ;;  %v1807_v18 = vpop.f32.mrb[2].mxu0 }
 0x109   : > { %v1870_v35 = vadd.f32 %v1869_v31, %v1868_v21  ;;  %v1871_v48 = vpop.f32.mrb[2].mxu1  ;;  %v1808_v56 = vpop.f32.mrb[3].mxu0 }
 0x10a   : > { %v1872_v53 = vpop.f32.mrb[3].mxu1  ;;  %v1099_v19 = vadd.f32 %v1806_v36, %v2871_v17  ;;  %v1809_v20 = vadd.f32 %v1808_v56, %v1807_v18 }
 0x10b   : > { %v1873_v7 = vadd.f32 %v1872_v53, %v1871_v48 }
 0x10c   : > { %v2874_v23 = vadd.f32 %v1870_v35, %v1099_v19  ;;  %v1102_v24 = vadd.f32 %v1809_v20, %v2871_v17 }
 0x10e   : > { %v2877_v28 = vadd.f32 %v1873_v7, %v1102_v24  ;;  %v1810_v29 = vpop.f32.mrb[4].mxu0 }
 0x10f   : > { %v1874_v13 = vpop.f32.mrb[4].mxu1  ;;  %v1811_v32 = vpop.f32.mrb[5].mxu0 }
 0x110   : > { %v1875_v22 = vpop.f32.mrb[5].mxu1  ;;  %v1812_v33 = vadd.f32 %v1811_v32, %v1810_v29  ;;  %v1813_v34 = vpop.f32.mrb[6].mxu0 }
 0x111   : > { %v1876_v25 = vadd.f32 %v1875_v22, %v1874_v13  ;;  %v1877_v26 = vpop.f32.mrb[6].mxu1  ;;  %v1814_v37 = vpop.f32.mrb[7].mxu0 }
 0x112   : > { %v1878_v27 = vpop.f32.mrb[7].mxu1  ;;  %v1107_v38 = vadd.f32 %v1812_v33, %v2871_v17  ;;  %v1815_v39 = vadd.f32 %v1814_v37, %v1813_v34 }
 0x113   : > { %v1879_v30 = vadd.f32 %v1878_v27, %v1877_v26 }
 0x114   : > { %v2880_v42 = vadd.f32 %v1876_v25, %v1107_v38  ;;  %v1110_v43 = vadd.f32 %v1815_v39, %v2871_v17 }
 0x116   : > { %v2883_v47 = vadd.f32 %v1879_v30, %v1110_v43  ;;  %v1816_v49 = vpop.f32.mrb[8].mxu0 }
 0x117   : > { %v1880_v40 = vpop.f32.mrb[8].mxu1  ;;  %v1817_v51 = vpop.f32.mrb[9].mxu0 }
 0x118   : > { %v1881_v41 = vpop.f32.mrb[9].mxu1  ;;  %v1818_v54 = vadd.f32 %v1817_v51, %v1816_v49  ;;  %v1819_v55 = vpop.f32.mrb[10].mxu0 }
 0x119   : > { %v1882_v44 = vadd.f32 %v1881_v41, %v1880_v40  ;;  %v1883_v45 = vpop.f32.mrb[10].mxu1  ;;  %v1820_v57 = vpop.f32.mrb[11].mxu0 }
 0x11a   : > { %v1884_v46 = vpop.f32.mrb[11].mxu1  ;;  %v1115_v58 = vadd.f32 %v1818_v54, %v2871_v17  ;;  %v1821_v59 = vadd.f32 %v1820_v57, %v1819_v55 }
 0x11b   : > { %v1885_v50 = vadd.f32 %v1884_v46, %v1883_v45 }
 0x11c   : > { %v2886_v63 = vadd.f32 %v1882_v44, %v1115_v58  ;;  %v1118_v0 = vadd.f32 %v1821_v59, %v2871_v17 }
 0x11e   : > { %v2889_v8 = vadd.f32 %v1885_v50, %v1118_v0  ;;  %v1822_v9 = vpop.f32.mrb[12].mxu0 }
 0x11f   : > { %v1886_v60 = vpop.f32.mrb[12].mxu1  ;;  %v1823_v11 = vpop.f32.mrb[13].mxu0 }
 0x120   : > { %v1887_v61 = vpop.f32.mrb[13].mxu1  ;;  %v1824_v12 = vadd.f32 %v1823_v11, %v1822_v9  ;;  %v1825_v14 = vpop.f32.mrb[14].mxu0 }
 0x121   : > { %v1888_v1 = vadd.f32 %v1887_v61, %v1886_v60  ;;  %v1889_v3 = vpop.f32.mrb[14].mxu1  ;;  %v1826_v52 = vpop.f32.mrb[15].mxu0 }
 0x122   : > { %v1890_v5 = vpop.f32.mrb[15].mxu1  ;;  %v1123_v62 = vadd.f32 %v1824_v12, %v2871_v17  ;;  %v1827_v2 = vadd.f32 %v1826_v52, %v1825_v14 }
 0x123   : > { %v1891_v10 = vadd.f32 %v1890_v5, %v1889_v3 }
 0x124   : > { %v2892_v21 = vadd.f32 %v1888_v1, %v1123_v62  ;;  %v1126_v31 = vadd.f32 %v1827_v2, %v2871_v17 }
 0x126   : > { %v2895_v6 = vadd.f32 %v1891_v10, %v1126_v31  ;;  %v1828_v7 = vpop.f32.mrb[16].mxu0 }
 0x127   : > { %v1892_v4 = vpop.f32.mrb[16].mxu1  ;;  %v1829_v36 = vpop.f32.mrb[17].mxu0 }
 0x128   : > { %v1893_v16 = vpop.f32.mrb[17].mxu1  ;;  %v1830_v18 = vadd.f32 %v1829_v36, %v1828_v7  ;;  %v1831_v56 = vpop.f32.mrb[18].mxu0 }
 0x129   : > { %v1894_v35 = vadd.f32 %v1893_v16, %v1892_v4  ;;  %v1895_v48 = vpop.f32.mrb[18].mxu1  ;;  %v1832_v19 = vpop.f32.mrb[19].mxu0 }
 0x12a   : > { %v1896_v53 = vpop.f32.mrb[19].mxu1  ;;  %v1131_v20 = vadd.f32 %v1830_v18, %v2871_v17  ;;  %v1833_v13 = vadd.f32 %v1832_v19, %v1831_v56 }
 0x12b   : > { %v1897_v15 = vadd.f32 %v1896_v53, %v1895_v48 }
 0x12c   : > { %v2898_v25 = vadd.f32 %v1894_v35, %v1131_v20  ;;  %v1134_v26 = vadd.f32 %v1833_v13, %v2871_v17 }
 0x12e   : > { %v2901_v32 = vadd.f32 %v1897_v15, %v1134_v26  ;;  %v1834_v33 = vpop.f32.mrb[20].mxu0 }
 0x12f   : > { %v1898_v22 = vpop.f32.mrb[20].mxu1  ;;  %v1835_v37 = vpop.f32.mrb[21].mxu0 }
 0x130   : > { %v1899_v24 = vpop.f32.mrb[21].mxu1  ;;  %v1836_v38 = vadd.f32 %v1835_v37, %v1834_v33  ;;  %v1837_v39 = vpop.f32.mrb[22].mxu0 }
 0x131   : > { %v1900_v27 = vadd.f32 %v1899_v24, %v1898_v22  ;;  %v1901_v29 = vpop.f32.mrb[22].mxu1  ;;  %v1838_v40 = vpop.f32.mrb[23].mxu0 }
 0x132   : > { %v1902_v30 = vpop.f32.mrb[23].mxu1  ;;  %v1139_v41 = vadd.f32 %v1836_v38, %v2871_v17  ;;  %v1839_v43 = vadd.f32 %v1838_v40, %v1837_v39 }
 0x133   : > { %v1903_v34 = vadd.f32 %v1902_v30, %v1901_v29 }
 0x134   : > { %v2904_v46 = vadd.f32 %v1900_v27, %v1139_v41  ;;  %v1142_v49 = vadd.f32 %v1839_v43, %v2871_v17 }
 0x136   : > { %v2907_v55 = vadd.f32 %v1903_v34, %v1142_v49  ;;  %v1840_v57 = vpop.f32.mrb[24].mxu0 }
 0x137   : > { %v1904_v44 = vpop.f32.mrb[24].mxu1  ;;  %v1841_v59 = vpop.f32.mrb[25].mxu0 }
 0x138   : > { %v1905_v45 = vpop.f32.mrb[25].mxu1  ;;  %v1842_v60 = vadd.f32 %v1841_v59, %v1840_v57  ;;  %v1843_v61 = vpop.f32.mrb[26].mxu0 }
 0x139   : > { %v1906_v50 = vadd.f32 %v1905_v45, %v1904_v44  ;;  %v1907_v51 = vpop.f32.mrb[26].mxu1  ;;  %v1844_v0 = vpop.f32.mrb[27].mxu0 }
 0x13a   : > { %v1908_v54 = vpop.f32.mrb[27].mxu1  ;;  %v1147_v1 = vadd.f32 %v1842_v60, %v2871_v17  ;;  %v1845_v3 = vadd.f32 %v1844_v0, %v1843_v61 }
 0x13b   : > { %v1909_v58 = vadd.f32 %v1908_v54, %v1907_v51 }
 0x13c   : > { %v2910_v10 = vadd.f32 %v1906_v50, %v1147_v1  ;;  %v1150_v11 = vadd.f32 %v1845_v3, %v2871_v17 }
 0x13e   : > { %v2913_v62 = vadd.f32 %v1909_v58, %v1150_v11  ;;  %v1846_v2 = vpop.f32.mrb[28].mxu0 }
 0x13f   : > { %v1910_v5 = vpop.f32.mrb[28].mxu1  ;;  %v1847_v16 = vpop.f32.mrb[29].mxu0 }
 0x140   : > { %v1911_v9 = vpop.f32.mrb[29].mxu1  ;;  %v1848_v31 = vadd.f32 %v1847_v16, %v1846_v2  ;;  %v1849_v35 = vpop.f32.mrb[30].mxu0 }
 0x141   : > { %v1912_v12 = vadd.f32 %v1911_v9, %v1910_v5  ;;  %v1913_v14 = vpop.f32.mrb[30].mxu1  ;;  %v1850_v48 = vpop.f32.mrb[31].mxu0 }
 0x142   : > { %v1914_v52 = vpop.f32.mrb[31].mxu1  ;;  %v1155_v53 = vadd.f32 %v1848_v31, %v2871_v17  ;;  %v1851_v7 = vadd.f32 %v1850_v48, %v1849_v35 }
 0x143   : > { %v1915_v4 = vadd.f32 %v1914_v52, %v1913_v14 }
 0x144   : > { %v2916_v18 = vadd.f32 %v1912_v12, %v1155_v53  ;;  %v1158_v56 = vadd.f32 %v1851_v7, %v2871_v17 }
 0x146   : > { %v2919_v22 = vadd.f32 %v1915_v4, %v1158_v56  ;;  %v1932_v24 = vpop.f32.mrb[32].mxu0 }
 0x147   : > { %v1996_v15 = vpop.f32.mrb[32].mxu1  ;;  %v1933_v27 = vpop.f32.mrb[33].mxu0 }
 0x148   : > { %v1997_v36 = vpop.f32.mrb[33].mxu1  ;;  %v1934_v29 = vadd.f32 %v1933_v27, %v1932_v24  ;;  %v1935_v30 = vpop.f32.mrb[34].mxu0 }
 0x149   : > { %v1998_v19 = vadd.f32 %v1997_v36, %v1996_v15  ;;  %v1999_v20 = vpop.f32.mrb[34].mxu1  ;;  %v1936_v33 = vpop.f32.mrb[35].mxu0 }
 0x14a   : > { %v2000_v13 = vpop.f32.mrb[35].mxu1  ;;  %v1293_v34 = vadd.f32 %v1934_v29, %v2874_v23  ;;  %v1937_v37 = vadd.f32 %v1936_v33, %v1935_v30 }
 0x14b   : > { %v2001_v26 = vadd.f32 %v2000_v13, %v1999_v20 }
 0x14c   : > { %v1296_v40 = vadd.f32 %v1937_v37, %v2877_v28  ;;  %v2923_v43 = vadd.f32 %v1998_v19, %v1293_v34 }
 0x14e   : > { %v1938_v45 = vpop.f32.mrb[36].mxu0  ;;  %v2925_v50 = vadd.f32 %v2001_v26, %v1296_v40 }
 0x14f   : > { %v2002_v38 = vpop.f32.mrb[36].mxu1  ;;  %v1939_v51 = vpop.f32.mrb[37].mxu0 }
 0x150   : > { %v2003_v39 = vpop.f32.mrb[37].mxu1  ;;  %v1940_v54 = vadd.f32 %v1939_v51, %v1938_v45  ;;  %v1941_v57 = vpop.f32.mrb[38].mxu0 }
 0x151   : > { %v2004_v41 = vadd.f32 %v2003_v39, %v2002_v38  ;;  %v2005_v17 = vpop.f32.mrb[38].mxu1  ;;  %v1942_v58 = vpop.f32.mrb[39].mxu0 }
 0x152   : > { %v2006_v44 = vpop.f32.mrb[39].mxu1  ;;  %v1301_v23 = vadd.f32 %v1940_v54, %v2880_v42  ;;  %v1943_v59 = vadd.f32 %v1942_v58, %v1941_v57 }
 0x153   : > { %v2007_v49 = vadd.f32 %v2006_v44, %v2005_v17 }
 0x154   : > { %v1304_v28 = vadd.f32 %v1943_v59, %v2883_v47  ;;  %v2929_v3 = vadd.f32 %v2004_v41, %v1301_v23 }
 0x156   : > { %v1944_v9 = vpop.f32.mrb[40].mxu0  ;;  %v2931_v12 = vadd.f32 %v2007_v49, %v1304_v28 }
 0x157   : > { %v2008_v60 = vpop.f32.mrb[40].mxu1  ;;  %v1945_v14 = vpop.f32.mrb[41].mxu0 }
 0x158   : > { %v2009_v61 = vpop.f32.mrb[41].mxu1  ;;  %v1946_v52 = vadd.f32 %v1945_v14, %v1944_v9  ;;  %v1947_v2 = vpop.f32.mrb[42].mxu0 }
 0x159   : > { %v2010_v0 = vadd.f32 %v2009_v61, %v2008_v60  ;;  %v2011_v1 = vpop.f32.mrb[42].mxu1  ;;  %v1948_v4 = vpop.f32.mrb[43].mxu0 }
 0x15a   : > { %v2012_v5 = vpop.f32.mrb[43].mxu1  ;;  %v1309_v42 = vadd.f32 %v1946_v52, %v2886_v63  ;;  %v1949_v16 = vadd.f32 %v1948_v4, %v1947_v2 }
 0x15b   : > { %v2013_v11 = vadd.f32 %v2012_v5, %v2011_v1 }
 0x15c   : > { %v1312_v47 = vadd.f32 %v1949_v16, %v2889_v8  ;;  %v2935_v7 = vadd.f32 %v2010_v0, %v1309_v42 }
 0x15e   : > { %v1950_v36 = vpop.f32.mrb[44].mxu0  ;;  %v2937_v19 = vadd.f32 %v2013_v11, %v1312_v47 }
 0x15f   : > { %v2014_v31 = vpop.f32.mrb[44].mxu1  ;;  %v1951_v20 = vpop.f32.mrb[45].mxu0 }
 0x160   : > { %v2015_v35 = vpop.f32.mrb[45].mxu1  ;;  %v1952_v13 = vadd.f32 %v1951_v20, %v1950_v36  ;;  %v1953_v24 = vpop.f32.mrb[46].mxu0 }
 0x161   : > { %v2016_v48 = vadd.f32 %v2015_v35, %v2014_v31  ;;  %v2017_v53 = vpop.f32.mrb[46].mxu1  ;;  %v1954_v26 = vpop.f32.mrb[47].mxu0 }
 0x162   : > { %v2018_v15 = vpop.f32.mrb[47].mxu1  ;;  %v1317_v63 = vadd.f32 %v1952_v13, %v2892_v21  ;;  %v1955_v27 = vadd.f32 %v1954_v26, %v1953_v24 }
 0x163   : > { %v2019_v56 = vadd.f32 %v2018_v15, %v2017_v53 }
 0x164   : > { %v1320_v8 = vadd.f32 %v1955_v27, %v2895_v6  ;;  %v2941_v37 = vadd.f32 %v2016_v48, %v1317_v63 }
 0x166   : > { %v1956_v39 = vpop.f32.mrb[48].mxu0  ;;  %v2943_v41 = vadd.f32 %v2019_v56, %v1320_v8 }
 0x167   : > { %v2020_v29 = vpop.f32.mrb[48].mxu1  ;;  %v1957_v17 = vpop.f32.mrb[49].mxu0 }
 0x168   : > { %v2021_v30 = vpop.f32.mrb[49].mxu1  ;;  %v1958_v44 = vadd.f32 %v1957_v17, %v1956_v39  ;;  %v1959_v45 = vpop.f32.mrb[50].mxu0 }
 0x169   : > { %v2022_v33 = vadd.f32 %v2021_v30, %v2020_v29  ;;  %v2023_v34 = vpop.f32.mrb[50].mxu1  ;;  %v1960_v49 = vpop.f32.mrb[51].mxu0 }
 0x16a   : > { %v2024_v38 = vpop.f32.mrb[51].mxu1  ;;  %v1325_v21 = vadd.f32 %v1958_v44, %v2898_v25  ;;  %v1961_v51 = vadd.f32 %v1960_v49, %v1959_v45 }
 0x16b   : > { %v2025_v40 = vadd.f32 %v2024_v38, %v2023_v34 }
 0x16c   : > { %v1328_v6 = vadd.f32 %v1961_v51, %v2901_v32  ;;  %v1422_v59 = vadd.f32 %v2022_v33, %v1325_v21 }
 0x16e   : > { %v1962_v61 = vpop.f32.mrb[52].mxu0  ;;  %v1425_v0 = vadd.f32 %v2025_v40, %v1328_v6 }
 0x16f   : > { %v2026_v54 = vpop.f32.mrb[52].mxu1  ;;  %v1963_v1 = vpop.f32.mrb[53].mxu0 }
 0x170   : > { %v2027_v57 = vpop.f32.mrb[53].mxu1  ;;  %v1964_v5 = vadd.f32 %v1963_v1, %v1962_v61  ;;  %v1965_v9 = vpop.f32.mrb[54].mxu0 }
 0x171   : > { %v2028_v58 = vadd.f32 %v2027_v57, %v2026_v54  ;;  %v2029_v23 = vpop.f32.mrb[54].mxu1  ;;  %v1966_v11 = vpop.f32.mrb[55].mxu0 }
 0x172   : > { %v2030_v60 = vpop.f32.mrb[55].mxu1  ;;  %v1333_v14 = vadd.f32 %v1964_v5, %v2904_v46  ;;  %v1967_v52 = vadd.f32 %v1966_v11, %v1965_v9 }
 0x173   : > { %v2031_v28 = vadd.f32 %v2030_v60, %v2029_v23 }
 0x174   : > { %v1336_v4 = vadd.f32 %v1967_v52, %v2907_v55  ;;  %v1430_v16 = vadd.f32 %v2028_v58, %v1333_v14 }
 0x176   : > { %v1968_v35 = vpop.f32.mrb[56].mxu0  ;;  %v1433_v48 = vadd.f32 %v2031_v28, %v1336_v4 }
 0x177   : > { %v2032_v25 = vpop.f32.mrb[56].mxu1  ;;  %v1969_v53 = vpop.f32.mrb[57].mxu0 }
 0x178   : > { %v2033_v2 = vpop.f32.mrb[57].mxu1  ;;  %v1970_v15 = vadd.f32 %v1969_v53, %v1968_v35  ;;  %v1971_v36 = vpop.f32.mrb[58].mxu0 }
 0x179   : > { %v2034_v42 = vadd.f32 %v2033_v2, %v2032_v25  ;;  %v2035_v32 = vpop.f32.mrb[58].mxu1  ;;  %v1972_v56 = vpop.f32.mrb[59].mxu0 }
 0x17a   : > { %v2036_v31 = vpop.f32.mrb[59].mxu1  ;;  %v1341_v20 = vadd.f32 %v1970_v15, %v2910_v10  ;;  %v1973_v46 = vadd.f32 %v1972_v56, %v1971_v36 }
 0x17b   : > { %v2037_v47 = vadd.f32 %v2036_v31, %v2035_v32 }
 0x17c   : > { %v1344_v55 = vadd.f32 %v1973_v46, %v2913_v62  ;;  %v1438_v27 = vadd.f32 %v2034_v42, %v1341_v20 }
 0x17e   : > { %v1974_v30 = vpop.f32.mrb[60].mxu0  ;;  %v1441_v33 = vadd.f32 %v2037_v47, %v1344_v55 }
 0x17f   : > { %v2038_v13 = vpop.f32.mrb[60].mxu1  ;;  %v1975_v34 = vpop.f32.mrb[61].mxu0 }
 0x180   : > { %v2039_v24 = vpop.f32.mrb[61].mxu1  ;;  %v1976_v38 = vadd.f32 %v1975_v34, %v1974_v30  ;;  %v1977_v39 = vpop.f32.mrb[62].mxu0 }
 0x181   : > { %v2040_v26 = vadd.f32 %v2039_v24, %v2038_v13  ;;  %v2041_v63 = vpop.f32.mrb[62].mxu1  ;;  %v1978_v40 = vpop.f32.mrb[63].mxu0 }
 0x182   : > { %v2042_v29 = vpop.f32.mrb[63].mxu1  ;;  %v1349_v10 = vadd.f32 %v1976_v38, %v2916_v18  ;;  %v1979_v17 = vadd.f32 %v1978_v40, %v1977_v39 }
 0x183   : > { %v2043_v8 = vadd.f32 %v2042_v29, %v2041_v63 }
 0x184   : > { %v1352_v49 = vadd.f32 %v1979_v17, %v2919_v22  ;;  %v1446_v54 = vadd.f32 %v2040_v26, %v1349_v10 }
 0x186   : > { %v2078_v23 = vpop.f32.mrb[64].mxu0  ;;  %v1449_v28 = vadd.f32 %v2043_v8, %v1352_v49 }
 0x187   : > { %v2086_v44 = vpop.f32.mrb[64].mxu1  ;;  %v1495_v1 = vadd.f32 %v2078_v23, %v2929_v3  ;;  %v1486_v18 = vpop.f32.mrb[65].mxu0 }
 0x188   : > { %v1527_v45 = vadd.f32 %v2086_v44, %v1430_v16  ;;  %v1518_v62 = vpop.f32.mrb[65].mxu1  ;;  %v2079_v5 = vpop.f32.mrb[66].mxu0 }
 0x189   : > { %v1519_v21 = vadd.f32 %v1518_v62, %v1422_v59  ;;  %v2087_v51 = vpop.f32.mrb[66].mxu1  ;;  %v1487_v59 = vadd.f32 %v1486_v18, %v2923_v43  ;;  %v1551_v9 = vmax.f32 %v1495_v1, 0.0  ;;  %v1498_v3 = vadd.f32 %v2079_v5, %v2931_v12  ;;  %v1489_v11 = vpop.f32.mrb[67].mxu0 }
 0x18a   : > { %v1559_v57 = vmax.f32 %v1527_v45, 0.0  ;;  %v1530_v6 = vadd.f32 %v2087_v51, %v1433_v48  ;;  %v1521_v58 = vpop.f32.mrb[67].mxu1  ;;  %v1490_v52 = vadd.f32 %v1489_v11, %v2925_v50 }
 0x18b   : > { %v1557_v60 = vmax.f32 %v1519_v21, 0.0  ;;  %v1522_v61 = vadd.f32 %v1521_v58, %v1425_v0  ;;  %v1549_v14 = vmax.f32 %v1487_v59, 0.0  ;;  %1567 = vst [vmem:[%s2957_s9 + $0x10] sm:$0xff] %v1551_v9  ;;  %v1552_v43 = vmax.f32 %v1498_v3, 0.0 }
 0x18c   : > { %1575 = vst [vmem:[%s2957_s9 + $0x50] sm:$0xff] %v1559_v57  ;;  %v1560_v22 = vmax.f32 %v1530_v6, 0.0  ;;  %v1550_v42 = vmax.f32 %v1490_v52, 0.0 }
 0x18d   : > { %1573 = vst [vmem:[%s2957_s9 + $0x40] sm:$0xff] %v1557_v60  ;;  %v1558_v0 = vmax.f32 %v1522_v61, 0.0  ;;  %1565 = vst [vmem:[%s2957_s9] sm:$0xff] %v1549_v14 }
 0x18e   : > { %1576 = vst [vmem:[%s2957_s9 + $0x58] sm:$0xff] %v1560_v22  ;;  %1568 = vst [vmem:[%s2957_s9 + $0x18] sm:$0xff] %v1552_v43  ;;  %v2082_v35 = vpop.f32.mrb[68].mxu0 }
 0x18f   : > { %1574 = vst [vmem:[%s2957_s9 + $0x48] sm:$0xff] %v1558_v0  ;;  %v2090_v25 = vpop.f32.mrb[68].mxu1  ;;  %1566 = vst [vmem:[%s2957_s9 + $0x8] sm:$0xff] %v1550_v42  ;;  %v1511_v53 = vadd.f32 %v2082_v35, %v2941_v37  ;;  %v1502_v15 = vpop.f32.mrb[69].mxu0 }
 0x190   : > { %v1543_v2 = vadd.f32 %v2090_v25, %v1446_v54  ;;  %v1534_v4 = vpop.f32.mrb[69].mxu1  ;;  %v1503_v56 = vadd.f32 %v1502_v15, %v2935_v7  ;;  %v2083_v20 = vpop.f32.mrb[70].mxu0 }
 0x191   : > { %v1535_v32 = vadd.f32 %v1534_v4, %v1438_v27  ;;  %v2091_v12 = vpop.f32.mrb[70].mxu1  ;;  %v1555_v13 = vmax.f32 %v1511_v53, 0.0  ;;  %v1514_v24 = vadd.f32 %v2083_v20, %v2943_v41  ;;  %v1505_v37 = vpop.f32.mrb[71].mxu0 }
 0x192   : > { %v1563_v16 = vmax.f32 %v1543_v2, 0.0  ;;  %v1546_v31 = vadd.f32 %v2091_v12, %v1449_v28  ;;  %v1537_v50 = vpop.f32.mrb[71].mxu1  ;;  %v1553_v55 = vmax.f32 %v1503_v56, 0.0  ;;  %v1506_v26 = vadd.f32 %v1505_v37, %v2937_v19 }
 0x193   : > { %v1561_v47 = vmax.f32 %v1535_v32, 0.0  ;;  %v1538_v48 = vadd.f32 %v1537_v50, %v1441_v33  ;;  %1571 = vst [vmem:[%s2957_s9 + $0x30] sm:$0xff] %v1555_v13  ;;  %v1556_v7 = vmax.f32 %v1514_v24, 0.0 }
 0x194   : > { %1579 = vst [vmem:[%s2957_s9 + $0x70] sm:$0xff] %v1563_v16  ;;  %v1564_v36 = vmax.f32 %v1546_v31, 0.0  ;;  %1569 = vst [vmem:[%s2957_s9 + $0x20] sm:$0xff] %v1553_v55  ;;  %v1554_v41 = vmax.f32 %v1506_v26, 0.0 }
 0x195   : > { %1577 = vst [vmem:[%s2957_s9 + $0x60] sm:$0xff] %v1561_v47  ;;  %v1562_v46 = vmax.f32 %v1538_v48, 0.0  ;;  %1572 = vst [vmem:[%s2957_s9 + $0x38] sm:$0xff] %v1556_v7 }
 0x196   : > { %1580 = vst [vmem:[%s2957_s9 + $0x78] sm:$0xff] %v1564_v36  ;;  %1570 = vst [vmem:[%s2957_s9 + $0x28] sm:$0xff] %v1554_v41 }
 0x197   : > { %1578 = vst [vmem:[%s2957_s9 + $0x68] sm:$0xff] %v1562_v46 }
 0x198   : > { %2287 = shalt.err (!%p2284_p6)
}
 0x199   : > { %s2288_s28 = scalar_lea.hbm %s2985_s29, 2048  ;;  %s2292_s10 = scalar_lea.hbm %s3049_s3, 8192 }
 0x19a   : > { %p2289_p7 = scmp.ne.s32.totalorder %s2985_s29, %s2288_s28  ;;  %p2293_p11 = scmp.lt.u32.totalorder %s2985_s29, %s3049_s3 }
 0x19b   : > { %p2294_p12 = scmp.lt.u32.totalorder %s2292_s10, %s2288_s28  ;;  %p2296_p0 = scmp.lt.u32.totalorder %s2288_s28, %s2985_s29 }
 0x19c   : > { %p2290_p9 = pnand %p2289_p7, %p2444_p3 }
 0x19d   : > { %p2295_p13 = por %p2294_p12, %p2293_p11 }
 0x19e   : > { %p2291_p10 = pneg %p2290_p9 }
 0x19f   : > { %p2297_p1 = por %p2296_p0, %p2295_p13 }
 0x1a1   : > { %p2298_p2 = pnand %p2297_p1, %p2291_p10 }
 0x1a3   : > { %2301 = shalt.err (!%p2298_p2)
}
 0x1a4   : > { %s2371_s15 = smov 128   ;;  %s2372_s24 = smov 8  }
 0x1a5   : > { %2109 = dma.vmem_to_hbm [thread:$0]  (%p2444_p3), %s2987_s16, 2048, %s2985_s29, %s2994_s11, %s2371_s15, %s2371_s15, %s2372_s24  }
 0x1a6 PF: > { %p2115_p4 = scmp.ge.s32.totalorder %s2368_s19, 2  ;;  %s1613_s27 = sand.u32 1, %s2340_s12  }
 0x1a7   : > { %s1614_s6 = scalar_lea.sflag [#allocation3], %s1613_s27 }
 0x1a8   : > { %p2112_p5 = pnand %p2115_p4, %p2453_p8 }
 0x1aa   : > { %2335 = dma.done.wait (!%p2112_p5), %s1614_s6, 2048  }
 0x1ab   : > { %2337 = vsyncadd (!%p2112_p5), %s1614_s6, 4294965248  ;;  %s16_s19 = sadd.s32 1, %s2368_s19   ;;  %s3052_s12 = smov %s2344_s13 }
 0x1ac   : > { %p13_p6 = scmp.ge.s32.totalorder %s16_s19, 6   ;;  %s3053_s13 = smov %s2348_s14 }
 0x1ad   : > { %s3054_s14 = smov %s2462_s30  ;;  %s3055_s15 = smov %s2360_s17 }
 0x1ae   : > { %s3056_s16 = smov %s2364_s18  ;;  %s3057_s17 = smov %s3060_s22 }
 0x1af   : > { %s3058_s18 = smov %s3064_s23  ;;  %15 = sbr.rel (!%p13_p6) target bundleno = 5 (0x5), region = 68 }
 0x1b6   :  { %1619 = vsyncpa [#allocation3], 1 }
 0x1b7   :  { %1621 = vsyncpa [#allocation3 + $0x1], 1 }

</bundles_post_ra>
